<compile_context>
chip_gen: v7x
topology: tpu7x:2x2x1
jax: 0.10.0
libtpu: 0.0.40
codegen_flags: <defaults>
</compile_context>

<pallas_src>
import functools

import jax
import jax.numpy as jnp
from jax.experimental import pallas as pl
from jax.experimental.pallas import tpu as pltpu

EPS = 1e-5          # InstanceNorm eps (nnUNet default props)
NEG_SLOPE = 1e-2    # LeakyReLU negative slope (nnUNet default props)


# ----------------------------------------------------------------------------- helpers
def _round_up(x, m):
    return ((x + m - 1) // m) * m


def _pick_tm(M, Kp, Cp, budget_bytes=48 << 20):
    """Largest spatial tile (multiple of 8) whose double-buffered working set fits VMEM."""
    full = _round_up(M, 8)
    for tm in (512, 256, 128, 64):
        if tm > full:
            continue
        need = 2 * (tm * Kp * 2 + Kp * Cp * 2 + tm * Cp * 4)
        if need <= budget_bytes:
            return tm
    return min(full, 64)


def _vmem_limit(*buf_bytes):
    need = 2 * int(sum(buf_bytes)) + (4 << 20)
    return int(min(max(need, 32 << 20), 64 << 20))


# ----------------------------------------------------------------------------- kernels
def _gemm_kernel(a_ref, b_ref, o_ref, *, activation):
    # a: (TM, Kp) bf16, b: (Kp, Cp) bf16, o: (TM, Cp) f32
    acc = jnp.dot(a_ref[...], b_ref[...], preferred_element_type=jnp.float32)
    if activation == "tanh":
        acc = jnp.tanh(acc)
    o_ref[...] = acc


def _conv_stats_kernel(p_ref, w_ref, o_ref, stats_ref):
    # Phase 1: conv-as-GEMM tile + per-channel sum / sum-of-squares accumulation.
    # p: (TM, Kp) bf16 im2col patches, w: (Kp, Cp) bf16, o: (TM, Cp) f32,
    # stats: (2, Cp) f32 accumulator resident across the spatial-tile axis.
    acc = jnp.dot(p_ref[...], w_ref[...], preferred_element_type=jnp.float32)
    o_ref[...] = acc

    @pl.when(pl.program_id(1) == 0)
    def _():
        stats_ref[...] = jnp.zeros_like(stats_ref)

    s1 = jnp.sum(acc, axis=0, keepdims=True)          # (1, Cp)
    s2 = jnp.sum(acc * acc, axis=0, keepdims=True)    # (1, Cp)
    stats_ref[...] += jnp.concatenate([s1, s2], axis=0)


def _in_lrelu_kernel(stats_ref, g_ref, b_ref, x_ref, o_ref, *, inv_count):
    # Phase 2: fold InstanceNorm + affine into one scale/shift, then LeakyReLU.
    mean = stats_ref[0:1, :] * inv_count
    var = jnp.maximum(stats_ref[1:2, :] * inv_count - mean * mean, 0.0)
    scale = g_ref[...] * jax.lax.rsqrt(var + EPS)
    shift = b_ref[...] - mean * scale
    y = x_ref[...] * scale + shift
    o_ref[...] = jnp.where(y >= 0.0, y, NEG_SLOPE * y)


# ----------------------------------------------------------------------------- wrappers
def pallas_gemm(a, b, activation="none"):
    """a: (N, M, K) f32, b: (K, C) f32 -> (N, M, C) f32 via bf16 MXU GEMM (lane-padded)."""
    N, M, K = a.shape
    C = b.shape[1]
    Kp, Cp = _round_up(K, 128), _round_up(C, 128)
    TM = _pick_tm(M, Kp, Cp)
    Mp = _round_up(M, TM)

    a_p = jnp.pad(a.astype(jnp.bfloat16), ((0, 0), (0, Mp - M), (0, Kp - K)))
    b_p = jnp.pad(b.astype(jnp.bfloat16), ((0, Kp - K), (0, Cp - C)))

    out = pl.pallas_call(
        functools.partial(_gemm_kernel, activation=activation),
        out_shape=jax.ShapeDtypeStruct((N, Mp, Cp), jnp.float32),
        grid=(N, Mp // TM),
        in_specs=[
            pl.BlockSpec((None, TM, Kp), lambda n, m: (n, m, 0)),
            pl.BlockSpec((Kp, Cp), lambda n, m: (0, 0)),
        ],
        out_specs=pl.BlockSpec((None, TM, Cp), lambda n, m: (n, m, 0)),
        compiler_params=pltpu.CompilerParams(
            dimension_semantics=("parallel", "parallel"),
            vmem_limit_bytes=_vmem_limit(TM * Kp * 2, Kp * Cp * 2, TM * Cp * 4)),
        cost_estimate=pl.CostEstimate(
            flops=2 * N * Mp * Kp * Cp,
            transcendentals=(N * Mp * Cp if activation == "tanh" else 0),
            bytes_accessed=N * Mp * Kp * 2 + Kp * Cp * 2 + N * Mp * Cp * 4),
    )(a_p, b_p)
    return out[:, :M, :C]


def conv_in_lrelu_block(x_nhwc, blk_params, kernel_size):
    """One ConvDropoutNormReLU block (decoder: stride 1, pad (k-1)//2, dropout p=0)."""
    N, H, W, Cin = x_nhwc.shape
    KH, KW = kernel_size
    ph, pw = (KH - 1) // 2, (KW - 1) // 2
    Ho, Wo = H, W  # all decoder convs are stride 1 (StackedConvLayers first_stride=None)

    # --- glue: pad + im2col (pure data rearrangement; GEMM operands go to HBM as bf16) ---
    # TODO(synk): implicit im2col (halo-band BlockSpec built inside the kernel) would cut
    # HBM traffic ~KH*KW x (matters most on v5e); kept explicit for simplicity/correctness.
    xp = jnp.pad(x_nhwc, ((0, 0), (ph, ph), (pw, pw), (0, 0)))
    cols = []
    for kh in range(KH):
        for kw in range(KW):
            cols.append(jax.lax.slice(xp, (0, kh, kw, 0), (N, kh + Ho, kw + Wo, Cin)))
    patches = jnp.stack(cols, axis=3).reshape(N, Ho * Wo, KH * KW * Cin)

    K = KH * KW * Cin
    w = blk_params["w"].reshape(K, -1)            # (KH,KW,Cin,Cout) -> (K, Cout)
    Cout = w.shape[1]
    M = Ho * Wo
    Kp, Cp = _round_up(K, 128), _round_up(Cout, 128)
    TM = _pick_tm(M, Kp, Cp)
    Mp = _round_up(M, TM)

    patches_p = jnp.pad(patches.astype(jnp.bfloat16), ((0, 0), (0, Mp - M), (0, Kp - K)))
    w_p = jnp.pad(w.astype(jnp.bfloat16), ((0, Kp - K), (0, Cp - Cout)))
    gamma_p = jnp.pad(blk_params["gamma"].reshape(1, Cout).astype(jnp.float32),
                      ((0, 0), (0, Cp - Cout)))
    beta_p = jnp.pad(blk_params["beta"].reshape(1, Cout).astype(jnp.float32),
                     ((0, 0), (0, Cp - Cout)))
    # NOTE: conv bias is intentionally NOT applied: a per-channel constant shift is
    # exactly cancelled by the following InstanceNorm (mean shifts, variance unchanged).
    # Zero-padded spatial rows contribute exact zeros to sum/sumsq, so stats stay correct.

    grid = (N, Mp // TM)

    conv_out, stats = pl.pallas_call(
        _conv_stats_kernel,
        out_shape=(jax.ShapeDtypeStruct((N, Mp, Cp), jnp.float32),
                   jax.ShapeDtypeStruct((N, 2, Cp), jnp.float32)),
        grid=grid,
        in_specs=[
            pl.BlockSpec((None, TM, Kp), lambda n, m: (n, m, 0)),
            pl.BlockSpec((Kp, Cp), lambda n, m: (0, 0)),
        ],
        out_specs=(
            pl.BlockSpec((None, TM, Cp), lambda n, m: (n, m, 0)),
            pl.BlockSpec((None, 2, Cp), lambda n, m: (n, 0, 0)),
        ),
        compiler_params=pltpu.CompilerParams(
            dimension_semantics=("parallel", "arbitrary"),
            vmem_limit_bytes=_vmem_limit(TM * Kp * 2, Kp * Cp * 2,
                                         TM * Cp * 4, 2 * Cp * 4)),
        cost_estimate=pl.CostEstimate(
            flops=2 * N * Mp * Kp * Cp,
            transcendentals=0,
            bytes_accessed=N * Mp * Kp * 2 + Kp * Cp * 2 + N * Mp * Cp * 4),
    )(patches_p, w_p)

    y = pl.pallas_call(
        functools.partial(_in_lrelu_kernel, inv_count=1.0 / float(M)),
        out_shape=jax.ShapeDtypeStruct((N, Mp, Cp), jnp.float32),
        grid=grid,
        in_specs=[
            pl.BlockSpec((None, 2, Cp), lambda n, m: (n, 0, 0)),
            pl.BlockSpec((1, Cp), lambda n, m: (0, 0)),
            pl.BlockSpec((1, Cp), lambda n, m: (0, 0)),
            pl.BlockSpec((None, TM, Cp), lambda n, m: (n, m, 0)),
        ],
        out_specs=pl.BlockSpec((None, TM, Cp), lambda n, m: (n, m, 0)),
        compiler_params=pltpu.CompilerParams(
            dimension_semantics=("parallel", "parallel"),
            vmem_limit_bytes=_vmem_limit(TM * Cp * 4, TM * Cp * 4, 4 * Cp * 4)),
    )(stats, gamma_p, beta_p, conv_out)

    return y[:, :M, :Cout].reshape(N, Ho, Wo, Cout)


def transp_conv(x_nhwc, w, pool):
    """ConvTranspose2d with kernel == stride == pool, bias=False. w: (Cin, KH, KW, Cout)."""
    N, H, W_, Cin = x_nhwc.shape
    KH, KW = pool
    Cout = w.shape[-1]
    y = pallas_gemm(x_nhwc.reshape(N, H * W_, Cin), w.reshape(Cin, KH * KW * Cout))
    y = y.reshape(N, H, W_, KH, KW, Cout)
    y = jnp.transpose(y, (0, 1, 3, 2, 4, 5)).reshape(N, H * KH, W_ * KW, Cout)
    return y


def conv1x1(x_nhwc, w, activation="none"):
    """1x1 conv, bias=False. w: (Cin, Cout). Optional fused tanh."""
    N, H, W_, Cin = x_nhwc.shape
    y = pallas_gemm(x_nhwc.reshape(N, H * W_, Cin), w, activation=activation)
    return y.reshape(N, H, W_, w.shape[1])


# ----------------------------------------------------------------------------- decoder
def build_decoder(stage_output_features, stage_pool_kernel_size,
                  stage_conv_op_kernel_size, num_blocks_per_stage_encoder,
                  num_classes):
    """Mirror DTCUNetDecoder.__init__ stage construction (2D)."""
    num_stages = len(stage_output_features) - 1
    num_blocks = list(num_blocks_per_stage_encoder[:-1])[::-1]
    assert len(num_blocks) == num_stages
    cfg = []
    for i, s in enumerate(list(range(num_stages))[::-1]):
        cfg.append(dict(
            features_below=stage_output_features[s + 1],
            features_skip=stage_output_features[s],
            tu_kernel=tuple(stage_pool_kernel_size[s + 1]),
            conv_kernel=tuple(stage_conv_op_kernel_size[s]),
            num_blocks=num_blocks[i],
        ))
    del num_classes  # kept for signature parity with the torch module
    return cfg


def init_decoder_params(cfg, num_classes, key):
    """Deterministic synthetic parameters (transpconv w, conv w/b, IN gamma/beta, heads)."""
    stages = []
    for i, st in enumerate(cfg):
        k = jax.random.fold_in(key, i)
        kh_t, kw_t = st["tu_kernel"]
        k_tu, k = jax.random.split(k)
        tu_w = jax.random.normal(
            k_tu, (st["features_below"], kh_t, kw_t, st["features_skip"]),
            jnp.float32) * 0.05
        blocks = []
        cin = 2 * st["features_skip"]
        for _ in range(st["num_blocks"]):
            kh, kw = st["conv_kernel"]
            k_w, k_b, k = jax.random.split(k, 3)
            blocks.append(dict(
                w=jax.random.normal(k_w, (kh, kw, cin, st["features_skip"]),
                                    jnp.float32) * 0.05,
                # conv bias kept for parameter parity; unused in compute (cancelled by IN)
                b=jax.random.normal(k_b, (st["features_skip"],), jnp.float32) * 0.01,
                gamma=jnp.ones((st["features_skip"],), jnp.float32),
                beta=jnp.zeros((st["features_skip"],), jnp.float32),
            ))
            cin = st["features_skip"]
        stages.append(dict(tu_w=tu_w, blocks=blocks))
    f_last = cfg[-1]["features_skip"]
    k_seg, k_reg = jax.random.split(jax.random.fold_in(key, 10_000))
    return dict(
        stages=stages,
        seg_w=jax.random.normal(k_seg, (f_last, num_classes), jnp.float32) * 0.05,
        reg_w=jax.random.normal(k_reg, (f_last, 1), jnp.float32) * 0.05,
    )


def dtc_unet_decoder_forward(skips_nchw, cfg, params):
    """Matches DTCUNetDecoder.forward with deep_supervision=False,
    compute_level_set_regression=True: returns (regression, segmentation), NCHW."""
    # TODO(synk): deep_supervision / upscale_logits (bilinear Upsample) branch not
    # implemented; the module defaults (both False) are the path reproduced here.
    skips = [jnp.transpose(s.astype(jnp.float32), (0, 2, 3, 1)) for s in skips_nchw]
    skips = skips[::-1]
    x = skips[0]
    for i, st in enumerate(cfg):
        sp = params["stages"][i]
        x = transp_conv(x, sp["tu_w"], st["tu_kernel"])       # upsample (transpconv)
        x = jnp.concatenate([x, skips[i + 1]], axis=-1)       # skip concat (channel dim)
        for bp in sp["blocks"]:                               # StackedConvLayers
            x = conv_in_lrelu_block(x, bp, st["conv_kernel"])
    segmentation = conv1x1(x, params["seg_w"])
    regression = conv1x1(x, params["reg_w"], activation="tanh")
    return (jnp.transpose(regression, (0, 3, 1, 2)),
            jnp.transpose(segmentation, (0, 3, 1, 2)))


if __name__ == "__main__":
    key = jax.random.PRNGKey(0)
    pkey, s0k, s1k, s2k = jax.random.split(key, 4)

    # Encoder-side config this decoder attaches to (2D, 3 stages, base 8 features x2/stage).
    stage_output_features = [8, 16, 32]
    stage_pool_kernel_size = [(1, 1), (2, 2), (2, 2)]
    stage_conv_op_kernel_size = [(3, 3), (3, 3), (3, 3)]
    num_blocks_per_stage_encoder = [2, 2, 2]
    num_classes = 3

    # Synthetic encoder skips (NCHW), highest resolution first, bottleneck last.
    skips = [
        jax.random.normal(s0k, (2, 8, 16, 16), jnp.float32),
        jax.random.normal(s1k, (2, 16, 8, 8), jnp.float32),
        jax.random.normal(s2k, (2, 32, 4, 4), jnp.float32),
    ]

    cfg = build_decoder(stage_output_features, stage_pool_kernel_size,
                        stage_conv_op_kernel_size, num_blocks_per_stage_encoder,
                        num_classes)
    params = init_decoder_params(cfg, num_classes, pkey)

    regression, segmentation = dtc_unet_decoder_forward(skips, cfg, params)
    regression, segmentation = jax.block_until_ready((regression, segmentation))

    assert segmentation.shape == (2, num_classes, 16, 16), segmentation.shape
    assert regression.shape == (2, 1, 16, 16), regression.shape
    assert bool(jnp.all(jnp.isfinite(segmentation)))
    assert bool(jnp.all(jnp.isfinite(regression)))
    assert bool(jnp.all(jnp.abs(regression) <= 1.0))   # tanh range check
    print("KERNEL_OK")
</pallas_src>

<mosaic_0001>
module attributes {stable_mosaic.version = 11 : i64} {
  func.func @_gemm_kernel(%arg0: i32, %arg1: i32, %arg2: memref<1x16x128xbf16, #tpu.memory_space<vmem>>, %arg3: memref<128x128xbf16, #tpu.memory_space<vmem>>, %arg4: memref<1x16x128xf32, #tpu.memory_space<vmem>>) attributes {dimension_semantics = [#tpu.dimension_semantics<parallel>, #tpu.dimension_semantics<parallel>], iteration_bounds = array<i64: 2, 1>, scalar_prefetch = 0 : i64, scratch_operands = 0 : i64, tpu.core_type = #tpu.core_type<tc>, window_params = [{transform_indices = @transform_0, window_bounds = array<i64: 1, 16, 128>}, {pipeline_mode = #tpu.pipeline_mode<synchronous>, transform_indices = @transform_1, window_bounds = array<i64: 128, 128>}, {transform_indices = @transform_2, window_bounds = array<i64: 1, 16, 128>}]} {
    %c0 = arith.constant 0 : index
    %c0_0 = arith.constant 0 : index
    %c0_1 = arith.constant 0 : index
    %0 = vector.load %arg2[%c0, %c0_0, %c0_1] : memref<1x16x128xbf16, #tpu.memory_space<vmem>>, vector<1x16x128xbf16>
    %1 = vector.shape_cast %0 : vector<1x16x128xbf16> to vector<16x128xbf16>
    %c0_2 = arith.constant 0 : index
    %c0_3 = arith.constant 0 : index
    %2 = vector.load %arg3[%c0_2, %c0_3] : memref<128x128xbf16, #tpu.memory_space<vmem>>, vector<128x128xbf16>
    %cst = arith.constant dense<0.000000e+00> : vector<16x128xf32>
    %3 = tpu.matmul %1, %2, %cst {dimension_numbers = #tpu.dot_dimension_numbers<[1], [0], [0], [1], [0, 0, 1, 1], [], []>} : vector<16x128xbf16>, vector<128x128xbf16>, vector<16x128xf32> -> vector<16x128xf32>
    %c0_4 = arith.constant 0 : index
    %c0_5 = arith.constant 0 : index
    %c0_6 = arith.constant 0 : index
    %4 = vector.load %arg4[%c0_4, %c0_5, %c0_6] : memref<1x16x128xf32, #tpu.memory_space<vmem>>, vector<1x16x128xf32>
    %5 = vector.shape_cast %4 : vector<1x16x128xf32> to vector<16x128xf32>
    %6 = vector.shape_cast %3 : vector<16x128xf32> to vector<1x16x128xf32>
    tpu.vector_store %arg4[%c0_4, %c0_5, %c0_6], %6 {strides = array<i32>} : memref<1x16x128xf32, #tpu.memory_space<vmem>>, vector<1x16x128xf32>,
    return
  }
  func.func @transform_0(%arg0: i32, %arg1: i32) -> (i32, i32, i32) {
    %c0_i32 = arith.constant 0 : i32
    %c0_i32_0 = arith.constant 0 : i32
    return %arg0, %arg1, %c0_i32 : i32, i32, i32
  }
  func.func @transform_1(%arg0: i32, %arg1: i32) -> (i32, i32) {
    %c0_i32 = arith.constant 0 : i32
    %c0_i32_0 = arith.constant 0 : i32
    %c0_i32_1 = arith.constant 0 : i32
    return %c0_i32, %c0_i32_0 : i32, i32
  }
  func.func @transform_2(%arg0: i32, %arg1: i32) -> (i32, i32, i32) {
    %c0_i32 = arith.constant 0 : i32
    %c0_i32_0 = arith.constant 0 : i32
    return %arg0, %arg1, %c0_i32 : i32, i32, i32
  }
}

</mosaic_0001>

<bundles_post_ra>
// kernel: tpu_custom_call.1
= control target key start
LH: loop header
LB: loop body
LE: loop exit
PB: predicated region body
PF: predicated region fallthrough
CT: control target
= control target key end

     0   :  { %7 = vsyncpa [#allocation3], 0  ;;  %s970_s0 = inlined_call_operand.hbm [shape: bf16[2,16,128], index: 0, kind: input, shape index: {}]   ;;  %s971_s1 = inlined_call_operand.hbm [shape: bf16[128,128], index: 1, kind: input, shape index: {}]   ;;  %s972_s2 = inlined_call_operand.hbm [shape: f32[2,16,128], index: 2, kind: output, shape index: {}]  }
   0x1   :  { %9 = vsyncpa [#allocation3 + $0x1], 0 }
   0x2   :  { %10 = vsyncpa [#allocation6], 0 }
   0x3   :  { %11 = vsyncpa [#allocation4], 0 }
   0x4   :  { %13 = vsyncpa [#allocation4 + $0x1], 0  ;;  %s741_s9 = smov 0   ;;  %s743_s10 = smov 0  }
   0x5   :  { %s745_s11 = smov 0   ;;  %s747_s12 = smov 0  }
   0x6   :  { %s749_s13 = smov 0   ;;  %s751_s14 = smov 0  }
   0x7 LB: > { %s426_s15 = sadd.s32 4294967295, %s715_s14   ;;  %s427_s16 = sadd.s32 4294967294, %s715_s14   ;;  %s715_s14 = sphi %s751_s14, %s19_s14   ;;  %s711_s13 = sphi %s749_s13, %s996_s13   ;;  %s707_s12 = sphi %s747_s12, %s995_s12   ;;  %s703_s11 = sphi %s745_s11, %s994_s11   ;;  %s699_s10 = sphi %s743_s10, %s993_s10   ;;  %s695_s9 = sphi %s741_s9, %s992_s9  }
   0x8   : > { %p53_p0 = scmp.ne.s32.totalorder %s699_s10, %s695_s9  ;;  %p775_p1 = scmp.eq.s32.totalorder %s426_s15, 0 }
   0x9   : > { %p779_p2 = scmp.eq.s32.totalorder %s426_s15, 1  ;;  %p106_p3 = scmp.eq.s32.totalorder %s427_s16, 1 }
   0xa   : > { %s977_s17 = scalar_select %p775_p1, 1, 0 }
   0xb   : > { %s978_s18 = scalar_select %p779_p2, 1, 0 }
   0xc   : > { %p785_p4 = por %p775_p1, %p53_p0  ;;  %p428_p5 = scmp.ge.s32.totalorder %s715_s14, 1 }
   0xd   : > { %p790_p6 = por %p106_p3, %p53_p0  ;;  %p113_p7 = scmp.lt.s32.totalorder %s715_s14, 3 }
   0xe   : > { %s979_s19 = scalar_select %p785_p4, 1, 0 }
   0xf   : > { %s980_s20 = scalar_select %p790_p6, 1, 0 }
  0x10   : > { %p795_p8 = pnand %p428_p5, %p113_p7  ;;  %s717_s22 = smov [#allocation5]  }
  0x11   : > { %s125_s23 = sshll.u32 %s717_s22, 4  ;;  %s31_s25 = sadd.s32 1, %s711_s13  ;;  %s126_s23 = int_to_ptr.vmem [resolvable:$true] %s125_s23 }
  0x12   : > { %s981_s21 = scalar_select %p795_p8, 1, 0 }
  0x13   : > { %p491_p9 = pneg %p795_p8  ;;  %s571_s28 = scalar_lea.hbm %s971_s1, 1024 }
  0x14   : > { %p572_p12 = scmp.ne.s32.totalorder %s971_s1, %s571_s28  ;;  %p578_p5 = scmp.lt.u32.totalorder %s571_s28, %s971_s1 }
  0x15   : > { %p804_p11 = pnand %p491_p9, %p775_p1 }
  0x17   : > { %p573_p13 = pneg %p804_p11 }
  0x19   : > { %p574_p0 = pnand %p573_p13, %p572_p12 }
  0x1b   : > { %p575_p3 = pneg %p574_p0 }
  0x1d   : > { %p580_p7 = pnand %p578_p5, %p575_p3 }
  0x1f   : > { %583 = shalt.err (!%p580_p7)
}
  0x20   : > { %s584_s5 = scalar_lea.vmem %s126_s23, 1024  ;;  %p592_p1 = scmp.lt.s32.totalorder %s126_s23, %s126_s23 }
  0x21   : > { %p585_p9 = scmp.ne.s32.totalorder %s126_s23, %s584_s5  ;;  %p593_p4 = scmp.lt.s32.totalorder %s584_s5, %s584_s5 }
  0x23   : > { %p587_p10 = pnand %p585_p9, %p573_p13  ;;  %p594_p8 = por %p593_p4, %p592_p1 }
  0x25   : > { %p588_p6 = pneg %p587_p10 }
  0x27   : > { %p595_p2 = pnand %p594_p8, %p588_p6 }
  0x29   : > { %598 = shalt.err (!%p595_p2)
}
  0x2a   : > { %s718_s6 = smov 64   ;;  %s719_s7 = smov 4  }
  0x2b   : > { %494 = dma.hbm_to_vmem [thread:$0]  (!%p804_p11), %s971_s1, 1024, %s126_s23, [#allocation6], %s718_s6, %s718_s6, %s719_s7  }
  0x2c   : > { %p33_p1 = scmp.ge.s32.totalorder %s31_s25, 2  ;;  %s40_s16 = sadd.s32 1, %s703_s11 }
  0x2d   : > { %p47_p2 = scmp.ne.s32.totalorder %s703_s11, %s699_s10  ;;  %p48_p4 = scmp.eq.s32.totalorder %s715_s14, 0 }
  0x2e   : > { %s998_s25 = smov (%p33_p1, %s31_s25), 0  ;;  %p984_p8 = scmp.ne.s32.totalorder %s978_s18, 0 }
  0x2f   : > { %p834_p6 = por %p48_p4, %p47_p2  ;;  %s35_s26 = ssub.s32 %s711_s13, %s998_s25 }
  0x30   : > { %p840_p10 = por %p984_p8, %p47_p2  ;;  %p504_p12 = scmp.lt.s32.totalorder %s715_s14, 2 }
  0x31   : > { %p38_p11 = scmp.eq.s32.totalorder %s35_s26, 0  ;;  %s139_s23 = sand.u32 1, %s703_s11  }
  0x32   : > { %s431_s27 = sshll.u32 %s139_s23, 3  ;;  %s452_s29 = sshll.u32 %s711_s13, 7 }
  0x33   : > { %s849_s28 = scalar_select %p38_p11, %s703_s11, %s40_s16  }
  0x34   : > { %s855_s4 = scalar_lea.hbm %s970_s0, %s452_s29  ;;  %s143_s18 = scalar_lea.vmem [#allocation2], %s431_s27 }
  0x35   : > { %s152_s5 = sshll.u32 %s143_s18, 4  ;;  %p861_p13 = pnand %p504_p12, %p834_p6  ;;  %s857_s5 = int_to_ptr.vmem [resolvable:$true] %s152_s5 }
  0x36   : > { %s865_s15 = scalar_lea.sflag [#allocation3], %s139_s23  ;;  %s599_s16 = scalar_lea.hbm %s855_s4, 128 }
  0x37   : > { %p600_p0 = scmp.ne.s32.totalorder %s855_s4, %s599_s16  ;;  %p601_p3 = pneg %p861_p13 }
  0x38   : > { %s604_s22 = scalar_lea.hbm %s970_s0, 256  ;;  %p605_p9 = scmp.lt.u32.totalorder %s855_s4, %s970_s0 }
  0x39   : > { %p602_p5 = pnand %p601_p3, %p600_p0  ;;  %p606_p1 = scmp.lt.u32.totalorder %s604_s22, %s599_s16 }
  0x3a   : > { %p608_p4 = scmp.lt.u32.totalorder %s599_s16, %s855_s4 }
  0x3b   : > { %p603_p7 = pneg %p602_p5  ;;  %p607_p2 = por %p606_p1, %p605_p9 }
  0x3d   : > { %p609_p6 = por %p608_p4, %p607_p2 }
  0x3f   : > { %p610_p8 = pnand %p609_p6, %p603_p7 }
  0x41   : > { %613 = shalt.err (!%p610_p8)
}
  0x42   : > { %s614_s23 = scalar_lea.vmem %s857_s5, 128  ;;  %s720_s3 = smov [#allocation2]  }
  0x43   : > { %p615_p12 = scmp.ne.s32.totalorder %s857_s5, %s614_s23  ;;  %s619_s18 = sshll.u32 %s720_s3, 4  ;;  %s620_s18 = int_to_ptr.vmem [resolvable:$false] %s619_s18 }
  0x44   : > { %s621_s26 = scalar_lea.vmem %s620_s18, 256  ;;  %p622_p5 = scmp.lt.s32.totalorder %s857_s5, %s620_s18 }
  0x45   : > { %p617_p11 = pnand %p615_p12, %p601_p3  ;;  %p623_p9 = scmp.lt.s32.totalorder %s621_s26, %s614_s23 }
  0x47   : > { %p618_p0 = pneg %p617_p11  ;;  %p624_p1 = por %p623_p9, %p622_p5 }
  0x49   : > { %p625_p2 = pnand %p624_p1, %p618_p0 }
  0x4b   : > { %628 = shalt.err (!%p625_p2)
}
  0x4c   : > { %498 = dma.hbm_to_vmem [thread:$0]  (!%p861_p13), %s855_s4, 128, %s857_s5, %s865_s15, %s718_s6, %s718_s6, %s719_s7  }
  0x4d   : > { %p987_p3 = scmp.ne.s32.totalorder %s981_s21, 0 }
  0x4e   : > { %s899_s16 = sand.u32 (!%p987_p3), 1, %s699_s10   ;;  %p988_p7 = scmp.ne.s32.totalorder (!%p987_p3), %s979_s19, 0 }
  0x4f   : > { %164 = sbr.rel (%p987_p3) target bundleno = 352 (0x160), region = 28  ;;  %s435_s27 = sshll.u32 (!%p987_p3), %s899_s16, 3 }
  0x50   : > { %s167_s22 = scalar_lea.sflag (!%p987_p3), [#allocation3], %s899_s16  ;;  %s903_s29 = scalar_lea.vmem (!%p987_p3), [#allocation2], %s435_s27 }
  0x56   : > { %682 = dma.done.wait (%p988_p7), %s167_s22, 128  }
  0x57   : > { %684 = vsyncadd (%p988_p7), %s167_s22, 4294967168  ;;  %p989_p13 = scmp.ne.s32.totalorder %s977_s17, 0 }
  0x59   : > { %686 = dma.done.wait (%p989_p13), [#allocation6], 1024  }
  0x5a   : > { %688 = vsyncadd (%p989_p13), [#allocation6], 4294966272  ;;  %v721_v0 = vmov 0.0   ;;  %vm722_vm0 = vmmov 0   ;;  %v562_v1 = vld [vmem:[#allocation5] sm:$0xff]   ;;  %v563_v2 = vld [vmem:[#allocation5 + $0x8] sm:$0xff]  }
  0x5b   : > { %463 = vmatprep.subr.bf16.mxu0 %v721_v0  ;;  %479 = vmatprep.mubr.msk.bf16.mxu0 %vm722_vm0, %v721_v0  ;;  %v564_v3 = vld [vmem:[#allocation5 + $0x10] sm:$0xff]   ;;  %v565_v4 = vld [vmem:[#allocation5 + $0x18] sm:$0xff]   ;;  %v566_v5 = vld [vmem:[#allocation5 + $0x20] sm:$0xff]   ;;  %s437_s17 = sshll.u32 %s899_s16, 4  ;;  %s453_s6 = sshll.u32 %s707_s12, 8 }
  0x5c   : > { %464 = vmatpush3.bf16.msra.mxu0 %v562_v1  ;;  %v567_v6 = vld [vmem:[#allocation5 + $0x28] sm:$0xff]   ;;  %v568_v7 = vld [vmem:[#allocation5 + $0x30] sm:$0xff]   ;;  %v569_v8 = vld [vmem:[#allocation5 + $0x38] sm:$0xff]   ;;  %s194_s19 = scalar_lea.vmem [#allocation7], %s437_s17  ;;  %s921_s5 = scalar_lea.hbm %s972_s2, %s453_s6 }
  0x5d   : > { %465 = vmatprep.subr.bf16.mxu0 %v721_v0  ;;  %v570_v9 = vld [vmem:[%s903_s29] sm:$0xff]   ;;  %s329_s21 = sshll.u32 %s194_s19, 4  ;;  %s314_s8 = scalar_lea.sflag [#allocation4], %s899_s16  ;;  %s916_s21 = int_to_ptr.vmem [resolvable:$true] %s329_s21 }
  0x5e   : > { %s629_s15 = scalar_lea.vmem %s916_s21, 256  ;;  %s723_s12 = smov [#allocation7]  }
  0x5f   : > { %p630_p4 = scmp.ne.s32.totalorder %s916_s21, %s629_s15  ;;  %s633_s30 = sshll.u32 %s723_s12, 4  ;;  %s634_s30 = int_to_ptr.vmem [resolvable:$false] %s633_s30 }
  0x60   : > { %466 = vmatpush3.bf16.msra.mxu0 %v563_v2  ;;  %s635_s23 = scalar_lea.vmem %s634_s30, 512  ;;  %p636_p12 = scmp.lt.s32.totalorder %s916_s21, %s634_s30 }
  0x61   : > { %467 = vmatprep.subr.bf16.mxu0 %v721_v0  ;;  %p631_p6 = pnand %p630_p4, %p840_p10  ;;  %p637_p11 = scmp.lt.s32.totalorder %s635_s23, %s629_s15 }
  0x63   : > { %p632_p8 = pneg %p631_p6  ;;  %p638_p0 = por %p637_p11, %p636_p12 }
  0x64   : > { %468 = vmatpush3.bf16.msra.mxu0 %v564_v3 }
  0x65   : > { %469 = vmatprep.subr.bf16.mxu0 %v721_v0  ;;  %p639_p5 = pnand %p638_p0, %p632_p8 }
  0x68   : > { %470 = vmatpush3.bf16.msra.mxu0 %v565_v4 }
  0x69   : > { %471 = vmatprep.subr.bf16.mxu0 %v721_v0 }
  0x6c   : > { %472 = vmatpush3.bf16.msra.mxu0 %v566_v5 }
  0x6d   : > { %473 = vmatprep.subr.bf16.mxu0 %v721_v0 }
  0x70   : > { %474 = vmatpush3.bf16.msra.mxu0 %v567_v6 }
  0x71   : > { %475 = vmatprep.subr.bf16.mxu0 %v721_v0 }
  0x74   : > { %476 = vmatpush3.bf16.msra.mxu0 %v568_v7 }
  0x75   : > { %477 = vmatprep.subr.bf16.mxu0 %v721_v0 }
  0x78   : > { %478 = vmatpush3.bf16.msra.mxu0 %v569_v8 }
  0x7b   : > { %480 = vmatmul.mubr.bf16.vlgmr.msra.gmra.mrb[0].mxu0 %v570_v9 }
 0x14e   : > { %v304_v10 = vpop.f32.mrb[0].mxu0 }
 0x14f   : > { %311 = vst [vmem:[%s194_s19] sm:$0xff] %v304_v10  ;;  %v481_v11 = vpop.f32.mrb[1].mxu0 }
 0x150   : > { %v307_v12 = vpop.f32.mrb[2].mxu0 }
 0x151   : > { %312 = vst [vmem:[%s194_s19 + $0x8] sm:$0xff] %v307_v12  ;;  %v482_v13 = vpop.f32.mrb[3].mxu0 }
 0x152   : > { %642 = shalt.err (!%p639_p5)
}
 0x153   : > { %s643_s3 = scalar_lea.hbm %s921_s5, 256  ;;  %s647_s27 = scalar_lea.hbm %s972_s2, 512 }
 0x154   : > { %p644_p9 = scmp.ne.s32.totalorder %s921_s5, %s643_s3  ;;  %p648_p3 = scmp.lt.u32.totalorder %s921_s5, %s972_s2 }
 0x155   : > { %p649_p7 = scmp.lt.u32.totalorder %s647_s27, %s643_s3  ;;  %p651_p4 = scmp.lt.u32.totalorder %s643_s3, %s921_s5 }
 0x156   : > { %p645_p1 = pnand %p644_p9, %p840_p10 }
 0x157   : > { %p650_p13 = por %p649_p7, %p648_p3 }
 0x158   : > { %p646_p2 = pneg %p645_p1 }
 0x159   : > { %p652_p6 = por %p651_p4, %p650_p13 }
 0x15b   : > { %p653_p8 = pnand %p652_p6, %p646_p2 }
 0x15d   : > { %656 = shalt.err (!%p653_p8)
}
 0x15e   : > { %s724_s17 = smov 128   ;;  %s725_s19 = smov 8  }
 0x15f   : > { %489 = dma.vmem_to_hbm [thread:$0]  (%p840_p10), %s916_s21, 256, %s921_s5, %s314_s8, %s724_s17, %s724_s17, %s725_s19  }
 0x160 PF: > { %s344_s6 = sand.u32 1, %s695_s9   ;;  %p990_p12 = scmp.ne.s32.totalorder %s980_s20, 0 }
 0x161   : > { %p991_p11 = scmp.ge.s32.totalorder %s715_s14, 2  ;;  %s345_s7 = scalar_lea.sflag [#allocation4], %s344_s6 }
 0x163   : > { %p500_p0 = pnand %p991_p11, %p990_p12 }
 0x165   : > { %690 = dma.done.wait (!%p500_p0), %s345_s7, 256  }
 0x166   : > { %692 = vsyncadd (!%p500_p0), %s345_s7, 4294967040  ;;  %s19_s14 = sadd.s32 1, %s715_s14   ;;  %s992_s9 = smov %s699_s10 }
 0x167   : > { %p16_p5 = scmp.ge.s32.totalorder %s19_s14, 4   ;;  %s993_s10 = smov %s703_s11 }
 0x168   : > { %s994_s11 = smov %s849_s28  ;;  %s995_s12 = smov %s711_s13 }
 0x169   : > { %s996_s13 = smov %s998_s25  ;;  %18 = sbr.rel (!%p16_p5) target bundleno = 7 (0x7), region = 77 }
 0x170   :  { %350 = vsyncpa [#allocation3], 1 }
 0x171   :  { %352 = vsyncpa [#allocation3 + $0x1], 1 }
 0x172   :  { %353 = vsyncpa [#allocation6], 1 }
 0x173   :  { %354 = vsyncpa [#allocation4], 1 }
 0x174   :  { %356 = vsyncpa [#allocation4 + $0x1], 1 }

</bundles_post_ra>
